<compile_context>
chip_gen: v7x
topology: tpu7x:2x2x1
jax: 0.10.0
libtpu: 0.0.40
codegen_flags: <defaults>
</compile_context>

<pallas_src>
import functools

import jax
import jax.numpy as jnp
from jax.experimental import pallas as pl
from jax.experimental.pallas import tpu as pltpu


# ---------------------------------------------------------------------------
# In-kernel helpers
# ---------------------------------------------------------------------------

def _swish(x):
    return x * jax.nn.sigmoid(x)


def _conv1x1(w, x):
    """1x1 conv as (C_out, C_in) @ (C_in, N) on a channels-on-sublanes slab.

    Tiny contractions are unrolled VPU broadcast-FMAs; bigger ones go to the
    MXU as bf16 with f32 accumulation.
    """
    c_out, c_in = w.shape
    if c_in <= 16:
        acc = w[:, 0:1] * x[0:1, :]
        for k in range(1, c_in):
            acc = acc + w[:, k:k + 1] * x[k:k + 1, :]
        return acc
    return jnp.dot(w.astype(jnp.bfloat16), x.astype(jnp.bfloat16),
                   preferred_element_type=jnp.float32)


def _store_tile_stats(st_ref, h):
    """One fused sweep: per-tile mean and M2 (sum of squared deviations).

    h: (C, N); st_ref block: (1, C, 2) -> col 0 = mean, col 1 = M2.
    """
    m = jnp.mean(h, axis=-1, keepdims=True)
    st_ref[0, :, 0:1] = m
    st_ref[0, :, 1:2] = jnp.sum((h - m) ** 2, axis=-1, keepdims=True)


def _combine_stats(partials, n_per_tile, eps):
    """Chan et al. merge of equal-count per-tile (mean, M2) partials.

    partials: (num_tiles, C, 2).  Returns (mean (C,1), rsqrt(var+eps) (C,1))
    with biased variance, exactly like torch BatchNorm2d in training mode.
    """
    m_b = partials[:, :, 0:1]                    # (T, C, 1)
    m2_b = partials[:, :, 1:2]
    num_tiles = partials.shape[0]
    mean = jnp.mean(m_b, axis=0)                 # (C, 1)
    m2 = jnp.sum(m2_b, axis=0) + n_per_tile * jnp.sum((m_b - mean) ** 2, axis=0)
    var = m2 / (num_tiles * n_per_tile)
    return mean, jax.lax.rsqrt(var + eps)


def _depthwise(a, taps, *, H, W, K):
    """Depthwise KxK, stride 1, SAME, on a (C, H*W) slab.

    Pixel shifts are XLU lane rotations (pltpu.roll) plus static boundary
    masks -- no padded scratch buffer, no misaligned sublane slices.
    shifted[:, i] = a[:, i + s] is roll by (-s) mod HW; wrapped lanes are
    exactly the masked-out-of-image positions.
    """
    hw = H * W
    pad = K // 2
    pos = jax.lax.broadcasted_iota(jnp.int32, (1, hw), 1)
    h_idx = pos // W
    w_idx = pos % W
    acc = jnp.zeros_like(a)
    t = 0
    for dh in range(-pad, pad + 1):
        for dw in range(-pad, pad + 1):
            s = dh * W + dw
            shifted = pltpu.roll(a, (-s) % hw, 1) if s != 0 else a
            valid = ((h_idx + dh >= 0) & (h_idx + dh < H) &
                     (w_idx + dw >= 0) & (w_idx + dw < W))
            acc = acc + jnp.where(valid, shifted, 0.0) * taps[:, t:t + 1]
            t += 1
    return acc


# ---------------------------------------------------------------------------
# Kernels (grid over batch; one image slab per grid step)
# ---------------------------------------------------------------------------

def _expand_stats_kernel(x_ref, w_exp_ref, st0_ref):
    # Pass 1: per-tile batch statistics of the 1x1 expand conv output.
    x = x_ref[0].astype(jnp.float32)                    # (C_in, HW)
    h1 = _conv1x1(w_exp_ref[...], x)                    # (C_mid, HW)
    _store_tile_stats(st0_ref, h1)


def _dw_stats_kernel(x_ref, w_exp_ref, g0_ref, b0_ref, st0_ref, w_dw_ref,
                     d_ref, st1_ref, *, H, W, K, n_pix, eps):
    # Pass 2: recompute expand (cheaper than an HBM round trip of the widest
    # tensor), BN0 + swish, depthwise KxK; emit d and its per-tile stats.
    x = x_ref[0].astype(jnp.float32)
    h1 = _conv1x1(w_exp_ref[...], x)
    mean0, inv0 = _combine_stats(st0_ref[...], n_pix, eps)
    a1 = _swish((h1 - mean0) * inv0 * g0_ref[...] + b0_ref[...])
    d = _depthwise(a1, w_dw_ref[...], H=H, W=W, K=K)
    d_ref[0] = d
    _store_tile_stats(st1_ref, d)


def _proj_stats_kernel(d_ref, g1_ref, b1_ref, st1_ref, w_proj_ref,
                       p_ref, st2_ref, *, n_pix, eps):
    # Pass 3: BN1 + swish, 1x1 project; emit p and its per-tile stats.
    mean1, inv1 = _combine_stats(st1_ref[...], n_pix, eps)
    a2 = _swish((d_ref[0] - mean1) * inv1 * g1_ref[...] + b1_ref[...])
    p = _conv1x1(w_proj_ref[...], a2)                   # (C_out, HW)
    p_ref[0] = p
    _store_tile_stats(st2_ref, p)


def _finalize_kernel(p_ref, x_ref, g2_ref, b2_ref, st2_ref, o_ref,
                     *, n_pix, eps, use_skip):
    # Pass 4: BN2 + identity skip; lane-dense (C_out, H*W) store == flat NCHW.
    mean2, inv2 = _combine_stats(st2_ref[...], n_pix, eps)
    out = (p_ref[0] - mean2) * inv2 * g2_ref[...] + b2_ref[...]
    if use_skip:
        out = out + x_ref[0].astype(jnp.float32)
    o_ref[0] = out.astype(o_ref.dtype)


# ---------------------------------------------------------------------------
# Host wrapper
# ---------------------------------------------------------------------------

def _img_spec(c, n):
    return pl.BlockSpec((1, c, n), lambda b: (b, 0, 0))


def _bcast_spec(shape):
    nd = len(shape)
    return pl.BlockSpec(shape, lambda b, nd=nd: (0,) * nd)


def _cparams():
    return pltpu.CompilerParams(dimension_semantics=("parallel",),
                                vmem_limit_bytes=32 * 1024 * 1024)


def inverted_residual_forward(x_nchw, params, *, stride=1, eps=1e-5):
    """Forward of InvertedResidual with training-mode BatchNorm statistics."""
    assert stride == 1, "TODO(synk): stride != 1 not implemented"
    B, C_in, H, W = x_nchw.shape
    HW = H * W

    w_exp = params["w_expand"][:, :, 0, 0]              # (C_mid, C_in)
    C_mid = w_exp.shape[0]
    K = params["w_dw"].shape[-1]
    w_dw = params["w_dw"].reshape(C_mid, K * K)         # row-major taps
    w_proj = params["w_proj"][:, :, 0, 0]               # (C_out, C_mid)
    C_out = w_proj.shape[0]

    col = lambda v: v.reshape(-1, 1).astype(jnp.float32)
    g0, b0 = col(params["bn0_g"]), col(params["bn0_b"])
    g1, b1 = col(params["bn1_g"]), col(params["bn1_b"])
    g2, b2 = col(params["bn2_g"]), col(params["bn2_b"])
    use_skip = (stride == 1) and (C_in == C_out)

    # NCHW -> (B, C, H*W): channels on sublanes, pixels on lanes (pure reshape).
    x = x_nchw.reshape(B, C_in, HW)
    f32 = jnp.float32
    stat_shape = lambda c: jax.ShapeDtypeStruct((B, c, 2), f32)

    # Pass 1: expand-conv batch statistics (tiny per-tile partials).
    st0 = pl.pallas_call(
        _expand_stats_kernel,
        out_shape=stat_shape(C_mid),
        grid=(B,),
        in_specs=[_img_spec(C_in, HW), _bcast_spec(w_exp.shape)],
        out_specs=_img_spec(C_mid, 2),
        compiler_params=_cparams(),
        cost_estimate=pl.CostEstimate(
            flops=int(2 * B * HW * C_in * C_mid), transcendentals=0,
            bytes_accessed=int(4 * (B * C_in * HW + B * C_mid * 2))),
    )(x, w_exp)

    # Pass 2: expand (recompute) -> BN0 -> swish -> depthwise; write d + stats.
    d, st1 = pl.pallas_call(
        functools.partial(_dw_stats_kernel, H=H, W=W, K=K, n_pix=HW, eps=eps),
        out_shape=(jax.ShapeDtypeStruct((B, C_mid, HW), f32), stat_shape(C_mid)),
        grid=(B,),
        in_specs=[_img_spec(C_in, HW), _bcast_spec(w_exp.shape),
                  _bcast_spec(g0.shape), _bcast_spec(b0.shape),
                  _bcast_spec(st0.shape), _bcast_spec(w_dw.shape)],
        out_specs=(_img_spec(C_mid, HW), _img_spec(C_mid, 2)),
        compiler_params=_cparams(),
        cost_estimate=pl.CostEstimate(
            flops=int(B * HW * C_mid * (2 * C_in + 2 * K * K + 8)),
            transcendentals=int(B * HW * C_mid),
            bytes_accessed=int(4 * (B * C_in * HW + B * C_mid * HW))),
    )(x, w_exp, g0, b0, st0, w_dw)

    # Pass 3: BN1 -> swish -> 1x1 project; write p + stats.
    p, st2 = pl.pallas_call(
        functools.partial(_proj_stats_kernel, n_pix=HW, eps=eps),
        out_shape=(jax.ShapeDtypeStruct((B, C_out, HW), f32), stat_shape(C_out)),
        grid=(B,),
        in_specs=[_img_spec(C_mid, HW), _bcast_spec(g1.shape),
                  _bcast_spec(b1.shape), _bcast_spec(st1.shape),
                  _bcast_spec(w_proj.shape)],
        out_specs=(_img_spec(C_out, HW), _img_spec(C_out, 2)),
        compiler_params=_cparams(),
        cost_estimate=pl.CostEstimate(
            flops=int(B * HW * C_mid * (2 * C_out + 8)),
            transcendentals=int(B * HW * C_mid),
            bytes_accessed=int(4 * (B * C_mid * HW + B * C_out * HW))),
    )(d, g1, b1, st1, w_proj)

    # Pass 4: BN2 + skip; output is flat NCHW, lane-dense store.
    out = pl.pallas_call(
        functools.partial(_finalize_kernel, n_pix=HW, eps=eps, use_skip=use_skip),
        out_shape=jax.ShapeDtypeStruct((B, C_out, HW), x_nchw.dtype),
        grid=(B,),
        in_specs=[_img_spec(C_out, HW), _img_spec(C_in, HW),
                  _bcast_spec(g2.shape), _bcast_spec(b2.shape),
                  _bcast_spec(st2.shape)],
        out_specs=_img_spec(C_out, HW),
        compiler_params=_cparams(),
        cost_estimate=pl.CostEstimate(
            flops=int(6 * B * HW * C_out), transcendentals=0,
            bytes_accessed=int(4 * (2 * B * C_out * HW + B * C_in * HW))),
    )(p, x, g2, b2, st2)

    return out.reshape(B, C_out, H, W)


# ---------------------------------------------------------------------------
# Parameters + pure-JAX reference (for a correctness check)
# ---------------------------------------------------------------------------

def init_inverted_residual_params(key, inp, oup, expand_ratio=4, kernel=3):
    """Deterministic synthetic parameters with PyTorch weight layouts."""
    c_mid = inp * expand_ratio
    ks = jax.random.split(key, 3)
    return {
        "w_expand": jax.random.normal(ks[0], (c_mid, inp, 1, 1), jnp.float32) * 0.2,
        "w_dw": jax.random.normal(ks[1], (c_mid, 1, kernel, kernel), jnp.float32) * 0.2,
        "w_proj": jax.random.normal(ks[2], (oup, c_mid, 1, 1), jnp.float32) * 0.2,
        # BatchNorm affine params at PyTorch defaults (gamma=1, beta=0).
        "bn0_g": jnp.ones((c_mid,), jnp.float32), "bn0_b": jnp.zeros((c_mid,), jnp.float32),
        "bn1_g": jnp.ones((c_mid,), jnp.float32), "bn1_b": jnp.zeros((c_mid,), jnp.float32),
        "bn2_g": jnp.ones((oup,), jnp.float32), "bn2_b": jnp.zeros((oup,), jnp.float32),
    }


def _reference(x, params, *, eps=1e-5, use_skip=True):
    """Plain-JAX (XLA) reference matching the PyTorch module in train mode."""
    dn = ("NCHW", "OIHW", "NCHW")
    hi = jax.lax.Precision.HIGHEST

    def bn(h, g, b):
        mean = jnp.mean(h, axis=(0, 2, 3), keepdims=True)
        var = jnp.mean((h - mean) ** 2, axis=(0, 2, 3), keepdims=True)
        return ((h - mean) * jax.lax.rsqrt(var + eps) * g.reshape(1, -1, 1, 1)
                + b.reshape(1, -1, 1, 1))

    h = jax.lax.conv_general_dilated(x, params["w_expand"], (1, 1), "VALID",
                                     dimension_numbers=dn, precision=hi)
    h = bn(h, params["bn0_g"], params["bn0_b"]); h = h * jax.nn.sigmoid(h)
    c_mid = h.shape[1]
    h = jax.lax.conv_general_dilated(h, params["w_dw"], (1, 1), "SAME",
                                     dimension_numbers=dn,
                                     feature_group_count=c_mid, precision=hi)
    h = bn(h, params["bn1_g"], params["bn1_b"]); h = h * jax.nn.sigmoid(h)
    h = jax.lax.conv_general_dilated(h, params["w_proj"], (1, 1), "VALID",
                                     dimension_numbers=dn, precision=hi)
    h = bn(h, params["bn2_g"], params["bn2_b"])
    return x + h if use_skip else h


if __name__ == "__main__":
    key = jax.random.PRNGKey(0)
    k_x, k_p = jax.random.split(key)

    # InvertedResidual(inp=4, oup=4, stride=1, expand_ratio=4, kernel=3)
    inp, oup, expand_ratio, kernel = 4, 4, 4, 3
    B, H, W = 2, 16, 16

    x = jax.random.normal(k_x, (B, inp, H, W), jnp.float32)          # NCHW
    params = init_inverted_residual_params(k_p, inp, oup, expand_ratio, kernel)

    y = inverted_residual_forward(x, params, stride=1, eps=1e-5)
    y = jax.block_until_ready(y)
    assert y.shape == (B, oup, H, W), y.shape
    assert bool(jnp.all(jnp.isfinite(y)))

    y_ref = _reference(x, params, eps=1e-5, use_skip=True)
    err = float(jnp.max(jnp.abs(y - y_ref)))
    assert err < 1e-3, f"max abs error vs reference: {err}"
    print("KERNEL_OK")
</pallas_src>

<mosaic_0001>
module attributes {stable_mosaic.version = 11 : i64} {
  func.func @_expand_stats_kernel(%arg0: i32, %arg1: memref<1x4x256xf32, #tpu.memory_space<vmem>>, %arg2: memref<16x4xf32, #tpu.memory_space<vmem>>, %arg3: memref<1x16x2xf32, #tpu.memory_space<vmem>>) attributes {dimension_semantics = [#tpu.dimension_semantics<parallel>], iteration_bounds = array<i64: 2>, scalar_prefetch = 0 : i64, scratch_operands = 0 : i64, tpu.core_type = #tpu.core_type<tc>, window_params = [{transform_indices = @transform_0, window_bounds = array<i64: 1, 4, 256>}, {pipeline_mode = #tpu.pipeline_mode<synchronous>, transform_indices = @transform_1, window_bounds = array<i64: 16, 4>}, {transform_indices = @transform_2, window_bounds = array<i64: 1, 16, 2>}]} {
    %c0 = arith.constant 0 : index
    %c0_0 = arith.constant 0 : index
    %c0_1 = arith.constant 0 : index
    %0 = vector.load %arg1[%c0, %c0_0, %c0_1] : memref<1x4x256xf32, #tpu.memory_space<vmem>>, vector<1x4x256xf32>
    %1 = vector.shape_cast %0 : vector<1x4x256xf32> to vector<4x256xf32>
    %c0_2 = arith.constant 0 : index
    %c0_3 = arith.constant 0 : index
    %2 = vector.load %arg2[%c0_2, %c0_3] : memref<16x4xf32, #tpu.memory_space<vmem>>, vector<16x4xf32>
    %3 = vector.extract_strided_slice %2 {offsets = [0, 0], sizes = [16, 1], strides = [1, 1]} : vector<16x4xf32> to vector<16x1xf32>
    %4 = vector.extract_strided_slice %1 {offsets = [0, 0], sizes = [1, 256], strides = [1, 1]} : vector<4x256xf32> to vector<1x256xf32>
    %5 = vector.broadcast %3 : vector<16x1xf32> to vector<16x256xf32>
    %6 = vector.broadcast %4 : vector<1x256xf32> to vector<16x256xf32>
    %7 = arith.mulf %5, %6 : vector<16x256xf32>
    %8 = vector.extract_strided_slice %2 {offsets = [0, 1], sizes = [16, 1], strides = [1, 1]} : vector<16x4xf32> to vector<16x1xf32>
    %9 = vector.extract_strided_slice %1 {offsets = [1, 0], sizes = [1, 256], strides = [1, 1]} : vector<4x256xf32> to vector<1x256xf32>
    %10 = vector.broadcast %8 : vector<16x1xf32> to vector<16x256xf32>
    %11 = vector.broadcast %9 : vector<1x256xf32> to vector<16x256xf32>
    %12 = arith.mulf %10, %11 : vector<16x256xf32>
    %13 = arith.addf %7, %12 : vector<16x256xf32>
    %14 = vector.extract_strided_slice %2 {offsets = [0, 2], sizes = [16, 1], strides = [1, 1]} : vector<16x4xf32> to vector<16x1xf32>
    %15 = vector.extract_strided_slice %1 {offsets = [2, 0], sizes = [1, 256], strides = [1, 1]} : vector<4x256xf32> to vector<1x256xf32>
    %16 = vector.broadcast %14 : vector<16x1xf32> to vector<16x256xf32>
    %17 = vector.broadcast %15 : vector<1x256xf32> to vector<16x256xf32>
    %18 = arith.mulf %16, %17 : vector<16x256xf32>
    %19 = arith.addf %13, %18 : vector<16x256xf32>
    %20 = vector.extract_strided_slice %2 {offsets = [0, 3], sizes = [16, 1], strides = [1, 1]} : vector<16x4xf32> to vector<16x1xf32>
    %21 = vector.extract_strided_slice %1 {offsets = [3, 0], sizes = [1, 256], strides = [1, 1]} : vector<4x256xf32> to vector<1x256xf32>
    %22 = vector.broadcast %20 : vector<16x1xf32> to vector<16x256xf32>
    %23 = vector.broadcast %21 : vector<1x256xf32> to vector<16x256xf32>
    %24 = arith.mulf %22, %23 : vector<16x256xf32>
    %25 = arith.addf %19, %24 : vector<16x256xf32>
    %cst = arith.constant dense<0.000000e+00> : vector<16xf32>
    %26 = vector.multi_reduction <add>, %25, %cst [1] : vector<16x256xf32> to vector<16xf32>
    %27 = vector.shape_cast %26 : vector<16xf32> to vector<16x1xf32>
    %cst_4 = arith.constant 2.560000e+02 : f32
    %28 = vector.broadcast %cst_4 : f32 to vector<16x1xf32>
    %29 = arith.divf %27, %28 : vector<16x1xf32>
    %c0_5 = arith.constant 0 : index
    %c0_6 = arith.constant 0 : index
    %c0_7 = arith.constant 0 : index
    %30 = vector.load %arg3[%c0_5, %c0_6, %c0_7] : memref<1x16x2xf32, #tpu.memory_space<vmem>>, vector<1x16x1xf32>
    %31 = vector.shape_cast %30 : vector<1x16x1xf32> to vector<16x1xf32>
    %32 = vector.shape_cast %29 : vector<16x1xf32> to vector<1x16x1xf32>
    tpu.vector_store %arg3[%c0_5, %c0_6, %c0_7], %32 {strides = array<i32>} : memref<1x16x2xf32, #tpu.memory_space<vmem>>, vector<1x16x1xf32>,
    %33 = vector.broadcast %29 : vector<16x1xf32> to vector<16x256xf32>
    %34 = arith.subf %25, %33 : vector<16x256xf32>
    %35 = arith.mulf %34, %34 : vector<16x256xf32>
    %cst_8 = arith.constant dense<0.000000e+00> : vector<16xf32>
    %36 = vector.multi_reduction <add>, %35, %cst_8 [1] : vector<16x256xf32> to vector<16xf32>
    %37 = vector.shape_cast %36 : vector<16xf32> to vector<16x1xf32>
    %c0_9 = arith.constant 0 : index
    %c0_10 = arith.constant 0 : index
    %c1 = arith.constant 1 : index
    %38 = vector.load %arg3[%c0_9, %c0_10, %c1] : memref<1x16x2xf32, #tpu.memory_space<vmem>>, vector<1x16x1xf32>
    %39 = vector.shape_cast %38 : vector<1x16x1xf32> to vector<16x1xf32>
    %40 = vector.shape_cast %37 : vector<16x1xf32> to vector<1x16x1xf32>
    tpu.vector_store %arg3[%c0_9, %c0_10, %c1], %40 {strides = array<i32>} : memref<1x16x2xf32, #tpu.memory_space<vmem>>, vector<1x16x1xf32>,
    return
  }
  func.func @transform_0(%arg0: i32) -> (i32, i32, i32) {
    %c0_i32 = arith.constant 0 : i32
    %c0_i32_0 = arith.constant 0 : i32
    %c0_i32_1 = arith.constant 0 : i32
    return %arg0, %c0_i32, %c0_i32_0 : i32, i32, i32
  }
  func.func @transform_1(%arg0: i32) -> (i32, i32) {
    %c0_i32 = arith.constant 0 : i32
    %c0_i32_0 = arith.constant 0 : i32
    %c0_i32_1 = arith.constant 0 : i32
    return %c0_i32, %c0_i32_0 : i32, i32
  }
  func.func @transform_2(%arg0: i32) -> (i32, i32, i32) {
    %c0_i32 = arith.constant 0 : i32
    %c0_i32_0 = arith.constant 0 : i32
    %c0_i32_1 = arith.constant 0 : i32
    return %arg0, %c0_i32, %c0_i32_0 : i32, i32, i32
  }
}

</mosaic_0001>

<bundles_post_ra>
// kernel: tpu_custom_call.1
= control target key start
LH: loop header
LB: loop body
LE: loop exit
PB: predicated region body
PF: predicated region fallthrough
CT: control target
= control target key end

     0   :  { %s424_s9 = smov 0   ;;  %s451_s0 = inlined_call_operand.vmem [shape: f32[2,4,256], index: 0, kind: input, shape index: {}]   ;;  %s452_s1 = inlined_call_operand.vmem [shape: f32[16,4], index: 1, kind: input, shape index: {}]   ;;  %s453_s2 = inlined_call_operand.vmem [shape: f32[2,16,2], index: 2, kind: output, shape index: {}]  }
   0x1 LB: > { %s366_s10 = sadd.s32 4294967295, %s403_s9   ;;  %p370_p0 = scmp.ge.s32.totalorder %s403_s9, 1  ;;  %s403_s9 = sphi %s424_s9, %s12_s9  }
   0x2   : > { %p112_p1 = scmp.lt.s32.totalorder %s403_s9, 3 }
   0x4   : > { %p113_p2 = pnand %p370_p0, %p112_p1 }
   0x5   : > { %v145_v0 = vld [vmem:[%s452_s1] sm:$0xff] (!%p113_p2)  ;;  %v405_v1 = vmov (!%p113_p2), 1   ;;  %v406_v2 = vmov (!%p113_p2), 0   ;;  %v146_v3 = vld [vmem:[%s452_s1 + $0x8] sm:$0xff] (!%p113_p2)  ;;  %v407_v4 = vmov (!%p113_p2), 2   ;;  %v408_v5 = vmov (!%p113_p2), 3  }
   0x6   : > { %116 = sbr.rel (%p113_p2) target bundleno = 449 (0x1c1), region = 28  ;;  %392 = vset.pattern.permute.xlu1 (!%p113_p2), %v405_v1  ;;  %391 = vset.pattern.permute.xlu0 (!%p113_p2), %v406_v2  ;;  %p134_p3 = scmp.lt.s32.totalorder (!%p113_p2), %s366_s10, 1  ;;  %v158_v6 = vlaneseq (!%p113_p2)  ;;  %vm291_vm0 = vcmask (!%p113_p2), 7168   ;;  %vm308_vm1 = vcmask (!%p113_p2), 15368  }
   0x7   : > { %181 = vperm.xlu1 (!%p113_p2), %392, %v145_v0   ;;  %149 = vperm.xlu0 (!%p113_p2), %391, %v145_v0  }
   0x8   : > { %v159_v7 = vshrl.u32 (!%p113_p2), %v158_v6, 7 }
   0xa   : > { %v190_v8 = vsub.s32 (!%p113_p2), 1, %v159_v7  ;;  %v194_v9 = vsub.s32 (!%p113_p2), 5, %v159_v7  ;;  %v160_v10 = vsub.s32 (!%p113_p2), 0, %v159_v7  ;;  %v164_v11 = vsub.s32 (!%p113_p2), 4, %v159_v7 }
   0xb   : > { %185 = vperm.xlu1 (!%p113_p2), %392, %v146_v3   ;;  %154 = vperm.xlu0 (!%p113_p2), %391, %v146_v3   ;;  %v224_v13 = vsub.s32 (!%p113_p2), 2, %v159_v7  ;;  %v228_v14 = vsub.s32 (!%p113_p2), 6, %v159_v7  ;;  %v258_v23 = vsub.s32 (!%p113_p2), 3, %v159_v7  ;;  %v262_v24 = vsub.s32 (!%p113_p2), 7, %v159_v7 }
   0xd   : > { %s455_s10 = smov (!%p134_p3, %s366_s10), 1 }
   0xe   : > { %s377_s15 = sshll.u32 %s455_s10, 3  ;;  %s378_s19 = sshll.u32 %s455_s10, 4 }
   0xf   : > { %394 = vset.pattern.permute.xlu1 %v407_v4  ;;  %393 = vset.pattern.permute.xlu0 %v407_v4  ;;  %s138_s18 = scalar_lea.vmem %s451_s0, %s377_s15  ;;  %s143_s22 = scalar_lea.vmem %s453_s2, %s378_s19 }
  0x10   : > { %219 = vperm.xlu1 %394, %v146_v3   ;;  %215 = vperm.xlu0 %393, %v145_v0   ;;  %v144_v12 = vld [vmem:[%s138_s18] sm:$0xff] }
  0x11   : > { %v191_v15 = vrot.slane %v144_v12, %v190_v8  ;;  %v195_v16 = vrot.slane %v144_v12, %v194_v9  ;;  %v161_v17 = vrot.slane %v144_v12, %v160_v10  ;;  %v165_v18 = vrot.slane %v144_v12, %v164_v11 }
  0x12   : > { %v225_v21 = vrot.slane %v144_v12, %v224_v13  ;;  %v229_v22 = vrot.slane %v144_v12, %v228_v14  ;;  %v259_v33 = vrot.slane %v144_v12, %v258_v23  ;;  %v263_v34 = vrot.slane %v144_v12, %v262_v24 }
  0x13   : > { %v201_v25 = vrot.slane %v191_v15, %v190_v8  ;;  %v205_v26 = vrot.slane %v195_v16, %v190_v8  ;;  %v171_v27 = vrot.slane %v161_v17, %v160_v10  ;;  %v175_v28 = vrot.slane %v165_v18, %v160_v10 }
  0x14   : > { %395 = vset.pattern.permute.xlu1 %v408_v5  ;;  %396 = vset.pattern.permute.xlu0 %v408_v5  ;;  %v235_v31 = vrot.slane %v225_v21, %v224_v13  ;;  %v239_v32 = vrot.slane %v229_v22, %v224_v13  ;;  %v269_v49 = vrot.slane %v259_v33, %v258_v23 }
  0x15   : > { %249 = vperm.xlu1 %395, %v145_v0   ;;  %253 = vperm.xlu0 %396, %v146_v3   ;;  %v273_v50 = vrot.slane %v263_v34, %v258_v23 }
  0x86   : > { %v182_v19 = vpop.permute.xlu1 %181  ;;  %v150_v20 = vpop.permute.xlu0 %149 }
  0x87   : > { %v206_v35 = vmul.f32 %v201_v25, %v182_v19  ;;  %v207_v36 = vmul.f32 %v205_v26, %v182_v19  ;;  %v176_v37 = vmul.f32 %v171_v27, %v150_v20  ;;  %v177_v38 = vmul.f32 %v175_v28, %v150_v20 }
  0x89   : > { %v210_v51 = vadd.f32 %v206_v35, %v176_v37  ;;  %v211_v52 = vadd.f32 %v207_v36, %v177_v38 }
  0x8a   : > { %v186_v29 = vpop.permute.xlu1 %185  ;;  %v155_v30 = vpop.permute.xlu0 %154 }
  0x8b   : > { %v208_v39 = vmul.f32 %v201_v25, %v186_v29  ;;  %v209_v40 = vmul.f32 %v205_v26, %v186_v29  ;;  %v178_v41 = vmul.f32 %v171_v27, %v155_v30  ;;  %v179_v42 = vmul.f32 %v175_v28, %v155_v30 }
  0x8d   : > { %v212_v53 = vadd.f32 %v208_v39, %v178_v41  ;;  %v213_v54 = vadd.f32 %v209_v40, %v179_v42 }
  0x8f   : > { %v220_v43 = vpop.permute.xlu1 %219  ;;  %v216_v44 = vpop.permute.xlu0 %215 }
  0x90   : > { %v242_v45 = vmul.f32 %v235_v31, %v220_v43  ;;  %v243_v46 = vmul.f32 %v239_v32, %v220_v43  ;;  %v240_v47 = vmul.f32 %v235_v31, %v216_v44  ;;  %v241_v48 = vmul.f32 %v239_v32, %v216_v44 }
  0x92   : > { %v246_v55 = vadd.f32 %v242_v45, %v212_v53  ;;  %v247_v56 = vadd.f32 %v243_v46, %v213_v54  ;;  %v244_v57 = vadd.f32 %v240_v47, %v210_v51  ;;  %v245_v58 = vadd.f32 %v241_v48, %v211_v52 }
  0x94   : > { %v250_v59 = vpop.permute.xlu1 %249  ;;  %v254_v60 = vpop.permute.xlu0 %253 }
  0x95   : > { %v274_v61 = vmul.f32 %v269_v49, %v250_v59  ;;  %v275_v62 = vmul.f32 %v273_v50, %v250_v59  ;;  %v276_v63 = vmul.f32 %v269_v49, %v254_v60  ;;  %v277_v0 = vmul.f32 %v273_v50, %v254_v60 }
  0x97   : > { %v280_v1 = vadd.f32 %v276_v63, %v246_v55  ;;  %v281_v2 = vadd.f32 %v277_v0, %v247_v56  ;;  %v278_v3 = vadd.f32 %v274_v61, %v244_v57  ;;  %v279_v4 = vadd.f32 %v275_v62, %v245_v58 }
  0x99   : > { %v285_v5 = vadd.f32 %v281_v2, %v280_v1  ;;  %v282_v6 = vadd.f32 %v279_v4, %v278_v3 }
  0x9b   : > { %286 = vadd.xlane.f32.xlu0 %v285_v5  ;;  %283 = vadd.xlane.f32.xlu1 %v282_v6 }
 0x128   : > { %v287_v7 = vpop.xlane.xlu0 %286  ;;  %v284_v8 = vpop.xlane.xlu1 %283 }
 0x129   : > { %v290_v9 = vmul.f32 0.00390625, %v287_v7  ;;  %v289_v10 = vmul.f32 0.00390625, %v284_v8 }
 0x12b   : > { %293 = vst.msk [vmem:[%s143_s22 + $0x8] sm:$0xff] %vm291_vm0, %v290_v9  ;;  %292 = vst.msk [vmem:[%s143_s22] sm:$0xff] %vm291_vm0, %v289_v10  ;;  %v296_v11 = vsub.f32 %v280_v1, %v290_v9  ;;  %v297_v12 = vsub.f32 %v281_v2, %v290_v9  ;;  %v294_v13 = vsub.f32 %v278_v3, %v289_v10 }
 0x12c   : > { %v295_v14 = vsub.f32 %v279_v4, %v289_v10 }
 0x12d   : > { %v300_v15 = vmul.f32 %v296_v11, %v296_v11  ;;  %v301_v16 = vmul.f32 %v297_v12, %v297_v12  ;;  %v298_v17 = vmul.f32 %v294_v13, %v294_v13 }
 0x12e   : > { %v299_v18 = vmul.f32 %v295_v14, %v295_v14 }
 0x12f   : > { %v305_v19 = vadd.f32 %v301_v16, %v300_v15 }
 0x130   : > { %v302_v20 = vadd.f32 %v299_v18, %v298_v17 }
 0x131   : > { %306 = vadd.xlane.f32.xlu0 %v305_v19 }
 0x132   : > { %303 = vadd.xlane.f32.xlu1 %v302_v20 }
 0x1be   : > { %v307_v21 = vpop.xlane.xlu0 %306 }
 0x1bf   : > { %v304_v22 = vpop.xlane.xlu1 %303  ;;  %310 = vst.msk [vmem:[%s143_s22 + $0x8] sm:$0xff] %vm308_vm1, %v307_v21 }
 0x1c0   : > { %309 = vst.msk [vmem:[%s143_s22] sm:$0xff] %vm308_vm1, %v304_v22 }
 0x1c1 PF: > { %s12_s9 = sadd.s32 1, %s403_s9  }
 0x1c2   : > { %p9_p4 = scmp.ge.s32.totalorder %s12_s9, 4  }
 0x1c4   :  { %11 = sbr.rel (!%p9_p4) target bundleno = 1 (0x1), region = 58 }

</bundles_post_ra>
